<compile_context>
chip_gen: v7x
topology: tpu7x:2x2x1
jax: 0.10.0
libtpu: 0.0.40
codegen_flags: <defaults>
</compile_context>

<pallas_src>
import functools

import jax
import jax.numpy as jnp
from jax.experimental import pallas as pl
from jax.experimental.pallas import tpu as pltpu


# ----------------------------------------------------------------------------- kernels


def conv_stats_kernel(p_ref, w_ref, b_ref, g_ref, beta_ref,      # inputs
                      y_ref, scale_ref, shift_ref,               # outputs
                      sum_ref, ssq_ref,                          # VMEM scratch
                      *, ts, s_valid, inv_count, needs_mask):
    """Pass 1: fused conv+mask-conv matmul, per-channel sum/sumsq accumulation, BN finalize."""
    ni = pl.program_id(0)
    si = pl.program_id(1)

    @pl.when((ni == 0) & (si == 0))
    def _init():
        sum_ref[...] = jnp.zeros_like(sum_ref)
        ssq_ref[...] = jnp.zeros_like(ssq_ref)

    cout = g_ref.shape[0]

    # Single MXU matmul for both convolutions (bf16 operands, f32 accumulation) + bias.
    y = jnp.dot(w_ref[...], p_ref[...], preferred_element_type=jnp.float32) + b_ref[...]
    y_ref[...] = y                                   # (2*Cout, TS): rows [:Cout]=conv, [Cout:]=mask

    # BatchNorm statistics accumulate only over the conv rows and only over valid columns.
    x = y[:cout]
    if needs_mask:
        col = si * ts + jax.lax.broadcasted_iota(jnp.int32, x.shape, 1)
        x = jnp.where(col < s_valid, x, 0.0)
    sum_ref[...] += jnp.sum(x, axis=1, keepdims=True)
    ssq_ref[...] += jnp.sum(x * x, axis=1, keepdims=True)

    @pl.when((ni == pl.num_programs(0) - 1) & (si == pl.num_programs(1) - 1))
    def _finalize():
        mean = sum_ref[...] * inv_count
        var = ssq_ref[...] * inv_count - mean * mean          # biased variance (training mode)
        sc = g_ref[...] * jax.lax.rsqrt(var + 1e-5)
        scale_ref[...] = sc
        shift_ref[...] = beta_ref[...] - mean * sc


def norm_gate_kernel(y_ref, scale_ref, shift_ref, o_ref):
    """Pass 2: folded BN affine + ReLU, gated by sigmoid(mask conv)."""
    cout = scale_ref.shape[0]
    y = y_ref[...]
    x = y[:cout]
    m = y[cout:]
    xn = x * scale_ref[...] + shift_ref[...]
    o_ref[...] = jnp.maximum(xn, 0.0) * jax.nn.sigmoid(m)


# ----------------------------------------------------------------------------- wrapper glue


def _round_up(v, m):
    return (v + m - 1) // m * m


def _im2col_3d(x, ksize, pad):
    """x: (N, Cin, D, H, W) -> (N, K^3*Cin, D*H*W). Pure slicing glue (bf16)."""
    n, cin, d, h, w = x.shape
    xp = jnp.pad(x, ((0, 0), (0, 0), (pad, pad), (pad, pad), (pad, pad)))
    cols = []
    for kd in range(ksize):
        for kh in range(ksize):
            for kw in range(ksize):
                sl = xp[:, :, kd:kd + d, kh:kh + h, kw:kw + w]   # (N, Cin, D, H, W)
                cols.append(sl.reshape(n, cin, -1))
    return jnp.concatenate(cols, axis=1)                         # (N, K3*Cin, S)


@functools.partial(jax.jit, static_argnames=("ksize", "pad"))
def lesion_gate_conv(x, w, b, wm, bm, gamma, beta, *, ksize=3, pad=1):
    """x: (N, Cin, D, H, W) NCDHW. Returns (N, Cout, D, H, W)."""
    n, cin, d, h, wd = x.shape
    cout = w.shape[0]
    s = d * h * wd
    k3cin = ksize ** 3 * cin

    # im2col in bf16 (halves the patch-stream HBM traffic).
    patches = _im2col_3d(x.astype(jnp.bfloat16), ksize, pad)      # (N, K3Cin, S)

    # Fuse conv + mask-conv weights into one (2*Cout, K3Cin) matrix (rows tap-major, Cin-minor,
    # matching the im2col row order), plus stacked bias.
    wf = jnp.concatenate([w, wm], axis=0)                         # (2C, Cin, K, K, K)
    wf = jnp.transpose(wf, (0, 2, 3, 4, 1)).reshape(2 * cout, k3cin).astype(jnp.bfloat16)
    bf = jnp.concatenate([b, bm], axis=0).reshape(2 * cout, 1).astype(jnp.float32)
    g2 = gamma.reshape(cout, 1).astype(jnp.float32)
    be2 = beta.reshape(cout, 1).astype(jnp.float32)

    # MXU-align the contraction dim; pick a lane-dense spatial tile from a VMEM budget that is
    # safe on all generations (v7x: 64 MiB physical / 32 MiB default-scoped VMEM).
    kp = _round_up(k3cin, 128)
    per_col_bytes = 2 * kp * 2 + 2 * (2 * cout) * 4               # dbl-buffered bf16 patches + f32 y
    ts_max = max(128, min(16384, (24 * 1024 * 1024 // per_col_bytes) // 128 * 128))
    ts = min(ts_max, _round_up(s, 128))
    s_pad = _round_up(s, ts)

    patches = jnp.pad(patches, ((0, 0), (0, kp - k3cin), (0, s_pad - s)))
    wf = jnp.pad(wf, ((0, 0), (0, kp - k3cin)))

    grid = (n, s_pad // ts)
    cparams = dict(vmem_limit_bytes=64 * 1024 * 1024)

    # ---- Pass 1: conv matmul + BN statistics (accumulate/finalize => whole grid "arbitrary").
    kern1 = functools.partial(
        conv_stats_kernel, ts=ts, s_valid=s,
        inv_count=1.0 / float(n * s), needs_mask=(s_pad != s))

    y, scale, shift = pl.pallas_call(
        kern1,
        out_shape=(
            jax.ShapeDtypeStruct((n, 2 * cout, s_pad), jnp.float32),
            jax.ShapeDtypeStruct((cout, 1), jnp.float32),
            jax.ShapeDtypeStruct((cout, 1), jnp.float32),
        ),
        grid_spec=pltpu.PrefetchScalarGridSpec(
            num_scalar_prefetch=0,
            grid=grid,
            in_specs=[
                pl.BlockSpec((None, kp, ts), lambda ni, si: (ni, 0, si)),
                pl.BlockSpec((2 * cout, kp), lambda ni, si: (0, 0)),
                pl.BlockSpec((2 * cout, 1), lambda ni, si: (0, 0)),
                pl.BlockSpec((cout, 1), lambda ni, si: (0, 0)),
                pl.BlockSpec((cout, 1), lambda ni, si: (0, 0)),
            ],
            out_specs=[
                pl.BlockSpec((None, 2 * cout, ts), lambda ni, si: (ni, 0, si)),
                pl.BlockSpec((cout, 1), lambda ni, si: (0, 0)),
                pl.BlockSpec((cout, 1), lambda ni, si: (0, 0)),
            ],
            scratch_shapes=[
                pltpu.VMEM((cout, 1), jnp.float32),
                pltpu.VMEM((cout, 1), jnp.float32),
            ],
        ),
        compiler_params=pltpu.CompilerParams(
            dimension_semantics=("arbitrary", "arbitrary"), **cparams),
    )(patches, wf, bf, g2, be2)

    # ---- Pass 2: normalize + ReLU + sigmoid gate (fully parallel; megacore-shardable).
    out = pl.pallas_call(
        norm_gate_kernel,
        out_shape=jax.ShapeDtypeStruct((n, cout, s_pad), jnp.float32),
        grid_spec=pltpu.PrefetchScalarGridSpec(
            num_scalar_prefetch=0,
            grid=grid,
            in_specs=[
                pl.BlockSpec((None, 2 * cout, ts), lambda ni, si: (ni, 0, si)),
                pl.BlockSpec((cout, 1), lambda ni, si: (0, 0)),
                pl.BlockSpec((cout, 1), lambda ni, si: (0, 0)),
            ],
            out_specs=pl.BlockSpec((None, cout, ts), lambda ni, si: (ni, 0, si)),
        ),
        compiler_params=pltpu.CompilerParams(
            dimension_semantics=("parallel", "parallel"), **cparams),
    )(y, scale, shift)

    if s_pad != s:
        out = out[:, :, :s]
    # (N, Cout, S) -> (N, Cout, D, H, W): pure reshape, no transpose / extra HBM pass.
    return out.reshape(n, cout, d, h, wd)


# ----------------------------------------------------------------------------- reference & test


def _reference(x, w, b, wm, bm, gamma, beta, pad=1):
    """Pure-JAX f32 reference (lax conv) mirroring the PyTorch forward."""
    dn = jax.lax.conv_dimension_numbers(x.shape, w.shape, ("NCDHW", "OIDHW", "NCDHW"))
    conv = lambda inp, ker, bias: jax.lax.conv_general_dilated(
        inp, ker, (1, 1, 1), [(pad, pad)] * 3, dimension_numbers=dn
    ) + bias.reshape(1, -1, 1, 1, 1)
    xc = conv(x, w, b)
    mc = conv(x, wm, bm)
    mean = jnp.mean(xc, axis=(0, 2, 3, 4), keepdims=True)
    var = jnp.mean((xc - mean) ** 2, axis=(0, 2, 3, 4), keepdims=True)
    xn = (xc - mean) * jax.lax.rsqrt(var + 1e-5)
    xn = xn * gamma.reshape(1, -1, 1, 1, 1) + beta.reshape(1, -1, 1, 1, 1)
    return jnp.maximum(xn, 0.0) * jax.nn.sigmoid(mc)


if __name__ == "__main__":
    # Small shapes consistent with the module.
    N, Cin, Cout, D, H, W, K, PAD = 2, 4, 8, 8, 8, 8, 3, 1

    key = jax.random.PRNGKey(0)
    kx, kw, kb, kwm, kbm = jax.random.split(key, 5)

    x = jax.random.normal(kx, (N, Cin, D, H, W), dtype=jnp.float32)

    # Conv3d-style init (uniform +-1/sqrt(fan_in)), fresh-module BN (gamma=1, beta=0).
    fan_in = Cin * K * K * K
    bound = 1.0 / (fan_in ** 0.5)
    w = jax.random.uniform(kw, (Cout, Cin, K, K, K), minval=-bound, maxval=bound)
    b = jax.random.uniform(kb, (Cout,), minval=-bound, maxval=bound)
    wm = jax.random.uniform(kwm, (Cout, Cin, K, K, K), minval=-bound, maxval=bound)
    bm = jax.random.uniform(kbm, (Cout,), minval=-bound, maxval=bound)
    gamma = jnp.ones((Cout,), jnp.float32)
    beta = jnp.zeros((Cout,), jnp.float32)

    out = lesion_gate_conv(x, w, b, wm, bm, gamma, beta, ksize=K, pad=PAD)
    out = jax.block_until_ready(out)

    ref = jax.block_until_ready(_reference(x, w, b, wm, bm, gamma, beta, pad=PAD))
    assert out.shape == (N, Cout, D, H, W), out.shape
    # bf16 matmul operands (f32 accumulation) -> tolerance loosened vs pure-f32 reference.
    assert jnp.allclose(out, ref, atol=5e-2, rtol=5e-2), float(jnp.max(jnp.abs(out - ref)))

    print("KERNEL_OK")
</pallas_src>

<mosaic_0001>
module attributes {stable_mosaic.version = 11 : i64} {
  func.func @conv_stats_kernel(%arg0: i32, %arg1: i32, %arg2: memref<1x128x512xbf16, #tpu.memory_space<vmem>>, %arg3: memref<16x128xbf16, #tpu.memory_space<vmem>>, %arg4: memref<16x1xf32, #tpu.memory_space<vmem>>, %arg5: memref<8x1xf32, #tpu.memory_space<vmem>>, %arg6: memref<8x1xf32, #tpu.memory_space<vmem>>, %arg7: memref<1x16x512xf32, #tpu.memory_space<vmem>>, %arg8: memref<8x1xf32, #tpu.memory_space<vmem>>, %arg9: memref<8x1xf32, #tpu.memory_space<vmem>>, %arg10: memref<8x1xf32, #tpu.memory_space<vmem>>, %arg11: memref<8x1xf32, #tpu.memory_space<vmem>>) attributes {dimension_semantics = [#tpu.dimension_semantics<arbitrary>, #tpu.dimension_semantics<arbitrary>], iteration_bounds = array<i64: 2, 1>, scalar_prefetch = 0 : i64, scratch_operands = 2 : i64, tpu.core_type = #tpu.core_type<tc>, window_params = [{transform_indices = @transform_0, window_bounds = array<i64: 1, 128, 512>}, {pipeline_mode = #tpu.pipeline_mode<synchronous>, transform_indices = @transform_1, window_bounds = array<i64: 16, 128>}, {pipeline_mode = #tpu.pipeline_mode<synchronous>, transform_indices = @transform_2, window_bounds = array<i64: 16, 1>}, {pipeline_mode = #tpu.pipeline_mode<synchronous>, transform_indices = @transform_3, window_bounds = array<i64: 8, 1>}, {pipeline_mode = #tpu.pipeline_mode<synchronous>, transform_indices = @transform_4, window_bounds = array<i64: 8, 1>}, {transform_indices = @transform_5, window_bounds = array<i64: 1, 16, 512>}, {pipeline_mode = #tpu.pipeline_mode<synchronous>, transform_indices = @transform_6, window_bounds = array<i64: 8, 1>}, {pipeline_mode = #tpu.pipeline_mode<synchronous>, transform_indices = @transform_7, window_bounds = array<i64: 8, 1>}]} {
    %c0_i32 = arith.constant 0 : i32
    %0 = arith.cmpi eq, %arg0, %c0_i32 : i32
    %c0_i32_0 = arith.constant 0 : i32
    %1 = arith.cmpi eq, %arg1, %c0_i32_0 : i32
    %2 = arith.andi %0, %1 : i1
    %3 = arith.extui %2 : i1 to i32
    %c0_i32_1 = arith.constant 0 : i32
    %4 = arith.cmpi ne, %3, %c0_i32_1 : i32
    scf.if %4 {
      %cst_23 = arith.constant 0.000000e+00 : f32
      %32 = vector.broadcast %cst_23 : f32 to vector<8x1xf32>
      %c0_24 = arith.constant 0 : index
      %c0_25 = arith.constant 0 : index
      %33 = vector.load %arg10[%c0_24, %c0_25] : memref<8x1xf32, #tpu.memory_space<vmem>>, vector<8x1xf32>
      tpu.vector_store %arg10[%c0_24, %c0_25], %32 {strides = array<i32>} : memref<8x1xf32, #tpu.memory_space<vmem>>, vector<8x1xf32>,
      %cst_26 = arith.constant 0.000000e+00 : f32
      %34 = vector.broadcast %cst_26 : f32 to vector<8x1xf32>
      %c0_27 = arith.constant 0 : index
      %c0_28 = arith.constant 0 : index
      %35 = vector.load %arg11[%c0_27, %c0_28] : memref<8x1xf32, #tpu.memory_space<vmem>>, vector<8x1xf32>
      tpu.vector_store %arg11[%c0_27, %c0_28], %34 {strides = array<i32>} : memref<8x1xf32, #tpu.memory_space<vmem>>, vector<8x1xf32>,
    } else {
    }
    %c0 = arith.constant 0 : index
    %c0_2 = arith.constant 0 : index
    %5 = vector.load %arg3[%c0, %c0_2] : memref<16x128xbf16, #tpu.memory_space<vmem>>, vector<16x128xbf16>
    %c0_3 = arith.constant 0 : index
    %c0_4 = arith.constant 0 : index
    %c0_5 = arith.constant 0 : index
    %6 = vector.load %arg2[%c0_3, %c0_4, %c0_5] : memref<1x128x512xbf16, #tpu.memory_space<vmem>>, vector<1x128x512xbf16>
    %7 = vector.shape_cast %6 : vector<1x128x512xbf16> to vector<128x512xbf16>
    %cst = arith.constant dense<0.000000e+00> : vector<16x512xf32>
    %8 = tpu.matmul %5, %7, %cst {dimension_numbers = #tpu.dot_dimension_numbers<[1], [0], [0], [1], [0, 0, 1, 1], [], []>} : vector<16x128xbf16>, vector<128x512xbf16>, vector<16x512xf32> -> vector<16x512xf32>
    %c0_6 = arith.constant 0 : index
    %c0_7 = arith.constant 0 : index
    %9 = vector.load %arg4[%c0_6, %c0_7] : memref<16x1xf32, #tpu.memory_space<vmem>>, vector<16x1xf32>
    %10 = vector.broadcast %9 : vector<16x1xf32> to vector<16x512xf32>
    %11 = arith.addf %8, %10 : vector<16x512xf32>
    %c0_8 = arith.constant 0 : index
    %c0_9 = arith.constant 0 : index
    %c0_10 = arith.constant 0 : index
    %12 = vector.load %arg7[%c0_8, %c0_9, %c0_10] : memref<1x16x512xf32, #tpu.memory_space<vmem>>, vector<1x16x512xf32>
    %13 = vector.shape_cast %12 : vector<1x16x512xf32> to vector<16x512xf32>
    %14 = vector.shape_cast %11 : vector<16x512xf32> to vector<1x16x512xf32>
    tpu.vector_store %arg7[%c0_8, %c0_9, %c0_10], %14 {strides = array<i32>} : memref<1x16x512xf32, #tpu.memory_space<vmem>>, vector<1x16x512xf32>,
    %15 = vector.extract_strided_slice %11 {offsets = [0, 0], sizes = [8, 512], strides = [1, 1]} : vector<16x512xf32> to vector<8x512xf32>
    %c0_11 = arith.constant 0 : index
    %c0_12 = arith.constant 0 : index
    %16 = vector.load %arg10[%c0_11, %c0_12] : memref<8x1xf32, #tpu.memory_space<vmem>>, vector<8x1xf32>
    %cst_13 = arith.constant dense<0.000000e+00> : vector<8xf32>
    %17 = vector.multi_reduction <add>, %15, %cst_13 [1] : vector<8x512xf32> to vector<8xf32>
    %18 = vector.shape_cast %17 : vector<8xf32> to vector<8x1xf32>
    %19 = arith.addf %16, %18 : vector<8x1xf32>
    %c0_14 = arith.constant 0 : index
    %c0_15 = arith.constant 0 : index
    %20 = vector.load %arg10[%c0_14, %c0_15] : memref<8x1xf32, #tpu.memory_space<vmem>>, vector<8x1xf32>
    tpu.vector_store %arg10[%c0_14, %c0_15], %19 {strides = array<i32>} : memref<8x1xf32, #tpu.memory_space<vmem>>, vector<8x1xf32>,
    %c0_16 = arith.constant 0 : index
    %c0_17 = arith.constant 0 : index
    %21 = vector.load %arg11[%c0_16, %c0_17] : memref<8x1xf32, #tpu.memory_space<vmem>>, vector<8x1xf32>
    %22 = arith.mulf %15, %15 : vector<8x512xf32>
    %cst_18 = arith.constant dense<0.000000e+00> : vector<8xf32>
    %23 = vector.multi_reduction <add>, %22, %cst_18 [1] : vector<8x512xf32> to vector<8xf32>
    %24 = vector.shape_cast %23 : vector<8xf32> to vector<8x1xf32>
    %25 = arith.addf %21, %24 : vector<8x1xf32>
    %c0_19 = arith.constant 0 : index
    %c0_20 = arith.constant 0 : index
    %26 = vector.load %arg11[%c0_19, %c0_20] : memref<8x1xf32, #tpu.memory_space<vmem>>, vector<8x1xf32>
    tpu.vector_store %arg11[%c0_19, %c0_20], %25 {strides = array<i32>} : memref<8x1xf32, #tpu.memory_space<vmem>>, vector<8x1xf32>,
    %c1_i32 = arith.constant 1 : i32
    %27 = arith.cmpi eq, %arg0, %c1_i32 : i32
    %c0_i32_21 = arith.constant 0 : i32
    %28 = arith.cmpi eq, %arg1, %c0_i32_21 : i32
    %29 = arith.andi %27, %28 : i1
    %30 = arith.extui %29 : i1 to i32
    %c0_i32_22 = arith.constant 0 : i32
    %31 = arith.cmpi ne, %30, %c0_i32_22 : i32
    scf.if %31 {
      %c0_23 = arith.constant 0 : index
      %c0_24 = arith.constant 0 : index
      %32 = vector.load %arg10[%c0_23, %c0_24] : memref<8x1xf32, #tpu.memory_space<vmem>>, vector<8x1xf32>
      %cst_25 = arith.constant 9.765625E-4 : f32
      %33 = vector.broadcast %cst_25 : f32 to vector<8x1xf32>
      %34 = arith.mulf %32, %33 : vector<8x1xf32>
      %c0_26 = arith.constant 0 : index
      %c0_27 = arith.constant 0 : index
      %35 = vector.load %arg11[%c0_26, %c0_27] : memref<8x1xf32, #tpu.memory_space<vmem>>, vector<8x1xf32>
      %cst_28 = arith.constant 9.765625E-4 : f32
      %36 = vector.broadcast %cst_28 : f32 to vector<8x1xf32>
      %37 = arith.mulf %35, %36 : vector<8x1xf32>
      %38 = arith.mulf %34, %34 : vector<8x1xf32>
      %39 = arith.subf %37, %38 : vector<8x1xf32>
      %c0_29 = arith.constant 0 : index
      %c0_30 = arith.constant 0 : index
      %40 = vector.load %arg5[%c0_29, %c0_30] : memref<8x1xf32, #tpu.memory_space<vmem>>, vector<8x1xf32>
      %cst_31 = arith.constant 9.99999974E-6 : f32
      %41 = vector.broadcast %cst_31 : f32 to vector<8x1xf32>
      %42 = arith.addf %39, %41 : vector<8x1xf32>
      %43 = math.rsqrt %42 : vector<8x1xf32>
      %44 = arith.mulf %40, %43 : vector<8x1xf32>
      %c0_32 = arith.constant 0 : index
      %c0_33 = arith.constant 0 : index
      %45 = vector.load %arg8[%c0_32, %c0_33] : memref<8x1xf32, #tpu.memory_space<vmem>>, vector<8x1xf32>
      tpu.vector_store %arg8[%c0_32, %c0_33], %44 {strides = array<i32>} : memref<8x1xf32, #tpu.memory_space<vmem>>, vector<8x1xf32>,
      %c0_34 = arith.constant 0 : index
      %c0_35 = arith.constant 0 : index
      %46 = vector.load %arg6[%c0_34, %c0_35] : memref<8x1xf32, #tpu.memory_space<vmem>>, vector<8x1xf32>
      %47 = arith.mulf %34, %44 : vector<8x1xf32>
      %48 = arith.subf %46, %47 : vector<8x1xf32>
      %c0_36 = arith.constant 0 : index
      %c0_37 = arith.constant 0 : index
      %49 = vector.load %arg9[%c0_36, %c0_37] : memref<8x1xf32, #tpu.memory_space<vmem>>, vector<8x1xf32>
      tpu.vector_store %arg9[%c0_36, %c0_37], %48 {strides = array<i32>} : memref<8x1xf32, #tpu.memory_space<vmem>>, vector<8x1xf32>,
    } else {
    }
    return
  }
  func.func @transform_0(%arg0: i32, %arg1: i32) -> (i32, i32, i32) {
    %c0_i32 = arith.constant 0 : i32
    %c0_i32_0 = arith.constant 0 : i32
    return %arg0, %c0_i32, %arg1 : i32, i32, i32
  }
  func.func @transform_1(%arg0: i32, %arg1: i32) -> (i32, i32) {
    %c0_i32 = arith.constant 0 : i32
    %c0_i32_0 = arith.constant 0 : i32
    %c0_i32_1 = arith.constant 0 : i32
    return %c0_i32, %c0_i32_0 : i32, i32
  }
  func.func @transform_2(%arg0: i32, %arg1: i32) -> (i32, i32) {
    %c0_i32 = arith.constant 0 : i32
    %c0_i32_0 = arith.constant 0 : i32
    %c0_i32_1 = arith.constant 0 : i32
    return %c0_i32, %c0_i32_0 : i32, i32
  }
  func.func @transform_3(%arg0: i32, %arg1: i32) -> (i32, i32) {
    %c0_i32 = arith.constant 0 : i32
    %c0_i32_0 = arith.constant 0 : i32
    %c0_i32_1 = arith.constant 0 : i32
    return %c0_i32, %c0_i32_0 : i32, i32
  }
  func.func @transform_4(%arg0: i32, %arg1: i32) -> (i32, i32) {
    %c0_i32 = arith.constant 0 : i32
    %c0_i32_0 = arith.constant 0 : i32
    %c0_i32_1 = arith.constant 0 : i32
    return %c0_i32, %c0_i32_0 : i32, i32
  }
  func.func @transform_5(%arg0: i32, %arg1: i32) -> (i32, i32, i32) {
    %c0_i32 = arith.constant 0 : i32
    %c0_i32_0 = arith.constant 0 : i32
    return %arg0, %c0_i32, %arg1 : i32, i32, i32
  }
  func.func @transform_6(%arg0: i32, %arg1: i32) -> (i32, i32) {
    %c0_i32 = arith.constant 0 : i32
    %c0_i32_0 = arith.constant 0 : i32
    %c0_i32_1 = arith.constant 0 : i32
    return %c0_i32, %c0_i32_0 : i32, i32
  }
  func.func @transform_7(%arg0: i32, %arg1: i32) -> (i32, i32) {
    %c0_i32 = arith.constant 0 : i32
    %c0_i32_0 = arith.constant 0 : i32
    %c0_i32_1 = arith.constant 0 : i32
    return %c0_i32, %c0_i32_0 : i32, i32
  }
}

module attributes {stable_mosaic.version = 11 : i64} {
  func.func @norm_gate_kernel(%arg0: i32, %arg1: i32, %arg2: memref<1x16x512xf32, #tpu.memory_space<vmem>>, %arg3: memref<8x1xf32, #tpu.memory_space<vmem>>, %arg4: memref<8x1xf32, #tpu.memory_space<vmem>>, %arg5: memref<1x8x512xf32, #tpu.memory_space<vmem>>) attributes {dimension_semantics = [#tpu.dimension_semantics<parallel>, #tpu.dimension_semantics<parallel>], iteration_bounds = array<i64: 2, 1>, scalar_prefetch = 0 : i64, scratch_operands = 0 : i64, tpu.core_type = #tpu.core_type<tc>, window_params = [{transform_indices = @transform_0, window_bounds = array<i64: 1, 16, 512>}, {pipeline_mode = #tpu.pipeline_mode<synchronous>, transform_indices = @transform_1, window_bounds = array<i64: 8, 1>}, {pipeline_mode = #tpu.pipeline_mode<synchronous>, transform_indices = @transform_2, window_bounds = array<i64: 8, 1>}, {transform_indices = @transform_3, window_bounds = array<i64: 1, 8, 512>}]} {
    %c0 = arith.constant 0 : index
    %c0_0 = arith.constant 0 : index
    %c0_1 = arith.constant 0 : index
    %0 = vector.load %arg2[%c0, %c0_0, %c0_1] : memref<1x16x512xf32, #tpu.memory_space<vmem>>, vector<1x16x512xf32>
    %1 = vector.shape_cast %0 : vector<1x16x512xf32> to vector<16x512xf32>
    %2 = vector.extract_strided_slice %1 {offsets = [0, 0], sizes = [8, 512], strides = [1, 1]} : vector<16x512xf32> to vector<8x512xf32>
    %3 = vector.extract_strided_slice %1 {offsets = [8, 0], sizes = [8, 512], strides = [1, 1]} : vector<16x512xf32> to vector<8x512xf32>
    %c0_2 = arith.constant 0 : index
    %c0_3 = arith.constant 0 : index
    %4 = vector.load %arg3[%c0_2, %c0_3] : memref<8x1xf32, #tpu.memory_space<vmem>>, vector<8x1xf32>
    %5 = vector.broadcast %4 : vector<8x1xf32> to vector<8x512xf32>
    %6 = arith.mulf %2, %5 : vector<8x512xf32>
    %c0_4 = arith.constant 0 : index
    %c0_5 = arith.constant 0 : index
    %7 = vector.load %arg4[%c0_4, %c0_5] : memref<8x1xf32, #tpu.memory_space<vmem>>, vector<8x1xf32>
    %8 = vector.broadcast %7 : vector<8x1xf32> to vector<8x512xf32>
    %9 = arith.addf %6, %8 : vector<8x512xf32>
    %cst = arith.constant 0.000000e+00 : f32
    %10 = vector.broadcast %cst : f32 to vector<8x512xf32>
    %11 = arith.maximumf %9, %10 : vector<8x512xf32>
    %12 = arith.negf %3 : vector<8x512xf32>
    %13 = math.exp %12 : vector<8x512xf32>
    %cst_6 = arith.constant 1.000000e+00 : f32
    %14 = vector.broadcast %cst_6 : f32 to vector<8x512xf32>
    %15 = arith.addf %14, %13 : vector<8x512xf32>
    %16 = arith.divf %14, %15 : vector<8x512xf32>
    %17 = arith.mulf %11, %16 : vector<8x512xf32>
    %c0_7 = arith.constant 0 : index
    %c0_8 = arith.constant 0 : index
    %c0_9 = arith.constant 0 : index
    %18 = vector.load %arg5[%c0_7, %c0_8, %c0_9] : memref<1x8x512xf32, #tpu.memory_space<vmem>>, vector<1x8x512xf32>
    %19 = vector.shape_cast %18 : vector<1x8x512xf32> to vector<8x512xf32>
    %20 = vector.shape_cast %17 : vector<8x512xf32> to vector<1x8x512xf32>
    tpu.vector_store %arg5[%c0_7, %c0_8, %c0_9], %20 {strides = array<i32>} : memref<1x8x512xf32, #tpu.memory_space<vmem>>, vector<1x8x512xf32>,
    return
  }
  func.func @transform_0(%arg0: i32, %arg1: i32) -> (i32, i32, i32) {
    %c0_i32 = arith.constant 0 : i32
    %c0_i32_0 = arith.constant 0 : i32
    return %arg0, %c0_i32, %arg1 : i32, i32, i32
  }
  func.func @transform_1(%arg0: i32, %arg1: i32) -> (i32, i32) {
    %c0_i32 = arith.constant 0 : i32
    %c0_i32_0 = arith.constant 0 : i32
    %c0_i32_1 = arith.constant 0 : i32
    return %c0_i32, %c0_i32_0 : i32, i32
  }
  func.func @transform_2(%arg0: i32, %arg1: i32) -> (i32, i32) {
    %c0_i32 = arith.constant 0 : i32
    %c0_i32_0 = arith.constant 0 : i32
    %c0_i32_1 = arith.constant 0 : i32
    return %c0_i32, %c0_i32_0 : i32, i32
  }
  func.func @transform_3(%arg0: i32, %arg1: i32) -> (i32, i32, i32) {
    %c0_i32 = arith.constant 0 : i32
    %c0_i32_0 = arith.constant 0 : i32
    return %arg0, %c0_i32, %arg1 : i32, i32, i32
  }
}

</mosaic_0001>

<bundles_post_ra>
// kernel: lesion_gate_conv.3
= control target key start
LH: loop header
LB: loop body
LE: loop exit
PB: predicated region body
PF: predicated region fallthrough
CT: control target
= control target key end

     0   :  { %8 = vsyncpa [#allocation3], 0  ;;  %s1004_s0 = inlined_call_operand.hbm [shape: f32[2,16,512], index: 0, kind: input, shape index: {}]   ;;  %s1005_s1 = inlined_call_operand.hbm [shape: f32[8,1], index: 1, kind: input, shape index: {}]   ;;  %s1006_s2 = inlined_call_operand.hbm [shape: f32[8,1], index: 2, kind: input, shape index: {}]   ;;  %s1007_s3 = inlined_call_operand.hbm [shape: f32[2,8,512], index: 3, kind: output, shape index: {}]  }
   0x1   :  { %10 = vsyncpa [#allocation3 + $0x1], 0 }
   0x2   :  { %11 = vsyncpa [#allocation6], 0 }
   0x3   :  { %12 = vsyncpa [#allocation4], 0 }
   0x4   :  { %14 = vsyncpa [#allocation4 + $0x1], 0  ;;  %s747_s12 = smov 0   ;;  %s749_s13 = smov 0  }
   0x5   :  { %s751_s14 = smov 0   ;;  %s753_s15 = smov 0  }
   0x6   :  { %s755_s16 = smov 0   ;;  %s757_s17 = smov 0  }
   0x7 LB: > { %s418_s18 = sadd.s32 4294967295, %s718_s17   ;;  %s419_s19 = sadd.s32 4294967294, %s718_s17   ;;  %s718_s17 = sphi %s757_s17, %s20_s17   ;;  %s714_s16 = sphi %s755_s16, %s1033_s16   ;;  %s710_s15 = sphi %s753_s15, %s1032_s15   ;;  %s706_s14 = sphi %s751_s14, %s1031_s14   ;;  %s702_s13 = sphi %s749_s13, %s1030_s13   ;;  %s698_s12 = sphi %s747_s12, %s1029_s12  }
   0x8   : > { %s41_s20 = sadd.s32 1, %s706_s14  ;;  %p48_p0 = scmp.ne.s32.totalorder %s706_s14, %s702_s13 }
   0x9   : > { %p49_p1 = scmp.eq.s32.totalorder %s718_s17, 0  ;;  %p54_p2 = scmp.ne.s32.totalorder %s702_s13, %s698_s12 }
   0xa   : > { %p785_p3 = scmp.eq.s32.totalorder %s418_s18, 0  ;;  %p122_p4 = scmp.eq.s32.totalorder %s418_s18, 1 }
   0xb   : > { %p789_p5 = por %p49_p1, %p48_p0  ;;  %p128_p6 = scmp.eq.s32.totalorder %s419_s19, 1 }
   0xc   : > { %s1014_s21 = scalar_select %p785_p3, 1, 0 }
   0xd   : > { %p795_p7 = por %p785_p3, %p54_p2  ;;  %p799_p8 = por %p122_p4, %p48_p0 }
   0xe   : > { %p803_p9 = por %p128_p6, %p54_p2  ;;  %p420_p10 = scmp.ge.s32.totalorder %s718_s17, 1 }
   0xf   : > { %s1016_s23 = scalar_select %p795_p7, 1, 0 }
  0x10   : > { %s1017_s24 = scalar_select %p799_p8, 1, 0 }
  0x11   : > { %s1018_s25 = scalar_select %p803_p9, 1, 0 }
  0x12   : > { %p135_p11 = scmp.lt.s32.totalorder %s718_s17, 3  ;;  %s720_s27 = smov [#allocation5]  }
  0x13   : > { %s148_s28 = sshll.u32 %s720_s27, 4  ;;  %p472_p1 = scmp.lt.s32.totalorder %s718_s17, 2  ;;  %s149_s28 = int_to_ptr.vmem [resolvable:$true] %s148_s28 }
  0x14   : > { %p810_p13 = pnand %p420_p10, %p135_p11  ;;  %s721_s30 = smov [#allocation7]  }
  0x15   : > { %p819_p4 = pnand %p472_p1, %p789_p5  ;;  %s159_s4 = sshll.u32 %s721_s30, 4  ;;  %s829_s4 = int_to_ptr.vmem [resolvable:$true] %s159_s4 }
  0x16   : > { %s1019_s26 = scalar_select %p810_p13, 1, 0 }
  0x17   : > { %p455_p0 = pneg %p810_p13  ;;  %s546_s8 = scalar_lea.hbm %s1005_s1, 128 }
  0x18   : > { %s1020_s29 = scalar_select %p819_p4, 1, 0 }
  0x19   : > { %p825_p2 = pnand %p455_p0, %p785_p3  ;;  %p547_p5 = scmp.ne.s32.totalorder %s1005_s1, %s546_s8 }
  0x1a   : > { %p553_p1 = scmp.lt.u32.totalorder %s546_s8, %s1005_s1 }
  0x1b   : > { %p548_p6 = pneg %p825_p2 }
  0x1d   : > { %p549_p10 = pnand %p548_p6, %p547_p5 }
  0x1f   : > { %p550_p11 = pneg %p549_p10 }
  0x21   : > { %p555_p0 = pnand %p553_p1, %p550_p11 }
  0x23   : > { %558 = shalt.err (!%p555_p0)
}
  0x24   : > { %s559_s19 = scalar_lea.vmem %s149_s28, 128  ;;  %p567_p3 = scmp.lt.s32.totalorder %s149_s28, %s149_s28 }
  0x25   : > { %p560_p12 = scmp.ne.s32.totalorder %s149_s28, %s559_s19  ;;  %p568_p7 = scmp.lt.s32.totalorder %s559_s19, %s559_s19 }
  0x27   : > { %p562_p9 = pnand %p560_p12, %p548_p6  ;;  %p569_p13 = por %p568_p7, %p567_p3 }
  0x29   : > { %p563_p8 = pneg %p562_p9 }
  0x2b   : > { %p570_p4 = pnand %p569_p13, %p563_p8 }
  0x2d   : > { %573 = shalt.err (!%p570_p4)
}
  0x2e   : > { %458 = dma.hbm_to_vmem [thread:$0]  (!%p825_p2), %s1005_s1, 128, %s149_s28, [#allocation6]  }
  0x2f   : > { %s574_s7 = scalar_lea.hbm %s1006_s2, 128 }
  0x30   : > { %p575_p9 = scmp.ne.s32.totalorder %s1006_s2, %s574_s7  ;;  %p581_p8 = scmp.lt.u32.totalorder %s574_s7, %s1006_s2 }
  0x32   : > { %p577_p3 = pnand %p575_p9, %p548_p6 }
  0x34   : > { %p578_p7 = pneg %p577_p3 }
  0x36   : > { %p583_p12 = pnand %p581_p8, %p578_p7 }
  0x38   : > { %586 = shalt.err (!%p583_p12)
}
  0x39   : > { %s587_s28 = scalar_lea.vmem %s829_s4, 128  ;;  %p595_p10 = scmp.lt.s32.totalorder %s829_s4, %s829_s4 }
  0x3a   : > { %p588_p13 = scmp.ne.s32.totalorder %s829_s4, %s587_s28  ;;  %p596_p11 = scmp.lt.s32.totalorder %s587_s28, %s587_s28 }
  0x3c   : > { %p590_p4 = pnand %p588_p13, %p548_p6  ;;  %p597_p1 = por %p596_p11, %p595_p10 }
  0x3e   : > { %p591_p5 = pneg %p590_p4 }
  0x40   : > { %p598_p0 = pnand %p597_p1, %p591_p5 }
  0x42   : > { %601 = shalt.err (!%p598_p0)
}
  0x43   : > { %461 = dma.hbm_to_vmem [thread:$0]  (!%p825_p2), %s1006_s2, 128, %s829_s4, [#allocation6]  }
  0x44   : > { %s32_s22 = sadd.s32 1, %s714_s16  ;;  %s170_s27 = sand.u32 1, %s706_s14  }
  0x45   : > { %p34_p6 = scmp.ge.s32.totalorder %s32_s22, 2  ;;  %s424_s30 = sshll.u32 %s170_s27, 6 }
  0x46   : > { %s441_s6 = sshll.u32 %s714_s16, 10  ;;  %s174_s4 = scalar_lea.vmem [#allocation2], %s424_s30 }
  0x47   : > { %s1035_s22 = smov (%p34_p6, %s32_s22), 0  ;;  %s886_s8 = scalar_lea.hbm %s1004_s0, %s441_s6 }
  0x48   : > { %s36_s9 = ssub.s32 %s714_s16, %s1035_s22  ;;  %s183_s10 = sshll.u32 %s174_s4, 4  ;;  %s890_s10 = int_to_ptr.vmem [resolvable:$true] %s183_s10 }
  0x49   : > { %p39_p2 = scmp.eq.s32.totalorder %s36_s9, 0  ;;  %s897_s28 = scalar_lea.sflag [#allocation3], %s170_s27 }
  0x4a   : > { %s602_s18 = scalar_lea.hbm %s886_s8, 1024  ;;  %p1022_p3 = scmp.ne.s32.totalorder %s1020_s29, 0 }
  0x4b   : > { %s895_s11 = scalar_select %p39_p2, %s706_s14, %s41_s20  }
  0x4c   : > { %p603_p9 = scmp.ne.s32.totalorder %s886_s8, %s602_s18  ;;  %p604_p7 = pneg %p1022_p3 }
  0x4d   : > { %s607_s30 = scalar_lea.hbm %s1004_s0, 2048  ;;  %p608_p13 = scmp.lt.u32.totalorder %s886_s8, %s1004_s0 }
  0x4e   : > { %p605_p8 = pnand %p604_p7, %p603_p9  ;;  %p609_p4 = scmp.lt.u32.totalorder %s607_s30, %s602_s18 }
  0x4f   : > { %p611_p10 = scmp.lt.u32.totalorder %s602_s18, %s886_s8 }
  0x50   : > { %p606_p12 = pneg %p605_p8  ;;  %p610_p5 = por %p609_p4, %p608_p13 }
  0x52   : > { %p612_p11 = por %p611_p10, %p610_p5 }
  0x54   : > { %p613_p1 = pnand %p612_p11, %p606_p12 }
  0x56   : > { %616 = shalt.err (!%p613_p1)
}
  0x57   : > { %s617_s20 = scalar_lea.vmem %s890_s10, 1024  ;;  %s722_s27 = smov [#allocation2]  }
  0x58   : > { %p618_p0 = scmp.ne.s32.totalorder %s890_s10, %s617_s20  ;;  %s622_s9 = sshll.u32 %s722_s27, 4  ;;  %s623_s9 = int_to_ptr.vmem [resolvable:$false] %s622_s9 }
  0x59   : > { %s624_s4 = scalar_lea.vmem %s623_s9, 2048  ;;  %p625_p9 = scmp.lt.s32.totalorder %s890_s10, %s623_s9 }
  0x5a   : > { %p620_p6 = pnand %p618_p0, %p604_p7  ;;  %p626_p8 = scmp.lt.s32.totalorder %s624_s4, %s617_s20 }
  0x5c   : > { %p621_p2 = pneg %p620_p6  ;;  %p627_p13 = por %p626_p8, %p625_p9 }
  0x5e   : > { %p628_p4 = pnand %p627_p13, %p621_p2 }
  0x60   : > { %631 = shalt.err (!%p628_p4)
}
  0x61   : > { %s723_s18 = smov 512   ;;  %s724_s19 = smov 32  }
  0x62   : > { %465 = dma.hbm_to_vmem [thread:$0]  (!%p1022_p3), %s886_s8, 1024, %s890_s10, %s897_s28, %s723_s18, %s723_s18, %s724_s19  }
  0x63   : > { %p1023_p7 = scmp.ne.s32.totalorder %s1019_s26, 0 }
  0x64   : > { %s928_s6 = sand.u32 (!%p1023_p7), 1, %s702_s13   ;;  %p1024_p12 = scmp.ne.s32.totalorder (!%p1023_p7), %s1016_s23, 0 }
  0x65   : > { %195 = sbr.rel (%p1023_p7) target bundleno = 267 (0x10b), region = 32  ;;  %s428_s30 = sshll.u32 (!%p1023_p7), %s928_s6, 6 }
  0x66   : > { %s198_s5 = scalar_lea.sflag (!%p1023_p7), [#allocation3], %s928_s6  ;;  %s932_s7 = scalar_lea.vmem (!%p1023_p7), [#allocation2], %s428_s30 }
  0x6c   : > { %685 = dma.done.wait (%p1024_p12), %s198_s5, 1024  }
  0x6d   : > { %687 = vsyncadd (%p1024_p12), %s198_s5, 4294966272  ;;  %p1025_p3 = scmp.ne.s32.totalorder %s1014_s21, 0 }
  0x6f   : > { %689 = dma.done.wait (%p1025_p3), [#allocation6], 256  }
  0x70   : > { %691 = vsyncadd (%p1025_p3), [#allocation6], 4294967040  ;;  %v725_v0 = vmov 0   ;;  %v242_v1 = vld [vmem:[#allocation5] sm:$0xff]  ;;  %v252_v2 = vld [vmem:[#allocation7] sm:$0xff]  ;;  %s431_s21 = sshll.u32 %s928_s6, 5 }
  0x71   : > { %529 = vset.pattern.permute.xlu0 %v725_v0  ;;  %v238_v3 = vld [vmem:[%s932_s7 + $0x20] sm:$0xff]  ;;  %v239_v4 = vld [vmem:[%s932_s7 + $0x28] sm:$0xff]  ;;  %v240_v5 = vld [vmem:[%s932_s7 + $0x30] sm:$0xff]  ;;  %s442_s23 = sshll.u32 %s710_s15, 9  ;;  %s231_s26 = scalar_lea.vmem [#allocation8], %s431_s21 }
  0x72   : > { %245 = vperm.xlu0 %529, %v242_v1   ;;  %v241_v6 = vld [vmem:[%s932_s7 + $0x38] sm:$0xff]  ;;  %v432_v7 = vmul.f32 -1.442695, %v238_v3  ;;  %v433_v8 = vmul.f32 -1.442695, %v239_v4  ;;  %v234_v19 = vld [vmem:[%s932_s7] sm:$0xff]  ;;  %s955_s28 = scalar_lea.hbm %s1007_s3, %s442_s23 }
  0x73   : > { %v434_v9 = vmul.f32 -1.442695, %v240_v5  ;;  %v435_v10 = vmul.f32 -1.442695, %v241_v6  ;;  %v235_v21 = vld [vmem:[%s932_s7 + $0x8] sm:$0xff]  ;;  %v236_v22 = vld [vmem:[%s932_s7 + $0x10] sm:$0xff] }
  0x74   : > { %530 = vpow2.f32 %v432_v7  ;;  %v237_v23 = vld [vmem:[%s932_s7 + $0x18] sm:$0xff]  ;;  %s315_s29 = sshll.u32 %s231_s26, 4  ;;  %s299_s15 = scalar_lea.sflag [#allocation4], %s928_s6  ;;  %s957_s29 = int_to_ptr.vmem [resolvable:$true] %s315_s29 }
  0x75   : > { %532 = vpow2.f32 %v433_v8  ;;  %s632_s20 = scalar_lea.vmem %s957_s29, 512  ;;  %p1026_p10 = scmp.ne.s32.totalorder %s1017_s24, 0 }
  0x76   : > { %255 = vperm.xlu0 %529, %v252_v2   ;;  %534 = vpow2.f32 %v434_v9  ;;  %p633_p5 = scmp.ne.s32.totalorder %s957_s29, %s632_s20  ;;  %s726_s27 = smov [#allocation8]  }
  0x77   : > { %536 = vpow2.f32 %v435_v10  ;;  %s636_s9 = sshll.u32 %s726_s27, 4  ;;  %s637_s9 = int_to_ptr.vmem [resolvable:$false] %s636_s9 }
  0x78   : > { %p634_p11 = pnand %p633_p5, %p1026_p10  ;;  %s638_s4 = scalar_lea.vmem %s637_s9, 1024 }
  0x79   : > { %p639_p0 = scmp.lt.s32.totalorder %s957_s29, %s637_s9  ;;  %p640_p6 = scmp.lt.s32.totalorder %s638_s4, %s632_s20 }
  0x7a   : > { %p635_p1 = pneg %p634_p11 }
  0x7b   : > { %p641_p2 = por %p640_p6, %p639_p0 }
  0x7d   : > { %p642_p9 = pnand %p641_p2, %p635_p1 }
  0x7e   : > { %v531_v11 = vpop.eup %530 }
  0x7f   : > { %v533_v12 = vpop.eup %532  ;;  %v278_v15 = vadd.f32 1.0, %v531_v11 }
  0x80   : > { %v535_v13 = vpop.eup %534  ;;  %v279_v16 = vadd.f32 1.0, %v533_v12 }
  0x81   : > { %v537_v14 = vpop.eup %536  ;;  %v280_v17 = vadd.f32 1.0, %v535_v13  ;;  %538 = vrcp.f32 %v278_v15 }
  0x82   : > { %v281_v18 = vadd.f32 1.0, %v537_v14  ;;  %540 = vrcp.f32 %v279_v16 }
  0x83   : > { %542 = vrcp.f32 %v280_v17 }
  0x84   : > { %544 = vrcp.f32 %v281_v18 }
  0x8b   : > { %v539_v24 = vpop.eup %538 }
  0x8c   : > { %v541_v29 = vpop.eup %540 }
  0x8d   : > { %v543_v31 = vpop.eup %542 }
  0x8e   : > { %v545_v36 = vpop.eup %544 }
  0xf1   : > { %v246_v20 = vpop.permute.xlu0 %245 }
  0xf2   : > { %v248_v25 = vmul.f32 %v246_v20, %v234_v19  ;;  %v249_v26 = vmul.f32 %v246_v20, %v235_v21  ;;  %v250_v27 = vmul.f32 %v246_v20, %v236_v22  ;;  %v251_v28 = vmul.f32 %v246_v20, %v237_v23 }
  0xf5   : > { %v256_v30 = vpop.permute.xlu0 %255 }
  0xf6   : > { %v258_v32 = vadd.f32 %v256_v30, %v248_v25  ;;  %v259_v33 = vadd.f32 %v256_v30, %v249_v26  ;;  %v260_v34 = vadd.f32 %v256_v30, %v250_v27  ;;  %v261_v35 = vadd.f32 %v256_v30, %v251_v28 }
  0xf8   : > { %v262_v37 = vmax.f32 %v258_v32, 0.0  ;;  %v263_v38 = vmax.f32 %v259_v33, 0.0  ;;  %v264_v39 = vmax.f32 %v260_v34, 0.0  ;;  %v265_v40 = vmax.f32 %v261_v35, 0.0 }
  0xfa   : > { %v290_v41 = vmul.f32 %v539_v24, %v262_v37  ;;  %v291_v42 = vmul.f32 %v541_v29, %v263_v38  ;;  %v292_v43 = vmul.f32 %v543_v31, %v264_v39  ;;  %v293_v44 = vmul.f32 %v545_v36, %v265_v40 }
  0xfc   : > { %294 = vst [vmem:[%s231_s26] sm:$0xff] %v290_v41  ;;  %295 = vst [vmem:[%s231_s26 + $0x8] sm:$0xff] %v291_v42 }
  0xfd   : > { %296 = vst [vmem:[%s231_s26 + $0x10] sm:$0xff] %v292_v43  ;;  %297 = vst [vmem:[%s231_s26 + $0x18] sm:$0xff] %v293_v44 }
  0xfe   : > { %645 = shalt.err (!%p642_p9)
}
  0xff   : > { %s646_s18 = scalar_lea.hbm %s955_s28, 512  ;;  %s650_s30 = scalar_lea.hbm %s1007_s3, 1024 }
 0x100   : > { %p647_p8 = scmp.ne.s32.totalorder %s955_s28, %s646_s18  ;;  %p651_p7 = scmp.lt.u32.totalorder %s955_s28, %s1007_s3 }
 0x101   : > { %p652_p12 = scmp.lt.u32.totalorder %s650_s30, %s646_s18  ;;  %p654_p5 = scmp.lt.u32.totalorder %s646_s18, %s955_s28 }
 0x102   : > { %p648_p13 = pnand %p647_p8, %p1026_p10 }
 0x103   : > { %p653_p3 = por %p652_p12, %p651_p7 }
 0x104   : > { %p649_p4 = pneg %p648_p13 }
 0x105   : > { %p655_p11 = por %p654_p5, %p653_p3 }
 0x107   : > { %p656_p1 = pnand %p655_p11, %p649_p4 }
 0x109   : > { %659 = shalt.err (!%p656_p1)
}
 0x10a   : > { %453 = dma.vmem_to_hbm [thread:$0]  (%p1026_p10), %s957_s29, 512, %s955_s28, %s299_s15  }
 0x10b PF: > { %s327_s21 = sand.u32 1, %s698_s12   ;;  %p1027_p0 = scmp.ne.s32.totalorder %s1018_s25, 0 }
 0x10c   : > { %p1028_p6 = scmp.ge.s32.totalorder %s718_s17, 2  ;;  %s328_s23 = scalar_lea.sflag [#allocation4], %s327_s21 }
 0x10e   : > { %p467_p2 = pnand %p1028_p6, %p1027_p0 }
 0x110   : > { %693 = dma.done.wait (!%p467_p2), %s328_s23, 512  }
 0x111   : > { %695 = vsyncadd (!%p467_p2), %s328_s23, 4294966784  ;;  %s20_s17 = sadd.s32 1, %s718_s17   ;;  %s1029_s12 = smov %s702_s13 }
 0x112   : > { %p17_p9 = scmp.ge.s32.totalorder %s20_s17, 4   ;;  %s1030_s13 = smov %s706_s14 }
 0x113   : > { %s1031_s14 = smov %s895_s11  ;;  %s1032_s15 = smov %s714_s16 }
 0x114   : > { %s1033_s16 = smov %s1035_s22  ;;  %19 = sbr.rel (!%p17_p9) target bundleno = 7 (0x7), region = 85 }
 0x11b   :  { %333 = vsyncpa [#allocation3], 1 }
 0x11c   :  { %335 = vsyncpa [#allocation3 + $0x1], 1 }
 0x11d   :  { %336 = vsyncpa [#allocation6], 1 }
 0x11e   :  { %337 = vsyncpa [#allocation4], 1 }
 0x11f   :  { %339 = vsyncpa [#allocation4 + $0x1], 1 }

// kernel: lesion_gate_conv.2
= control target key start
LH: loop header
LB: loop body
LE: loop exit
PB: predicated region body
PF: predicated region fallthrough
CT: control target
= control target key end

     0   :  { %s1894_s0 = inlined_call_operand.hbm [shape: bf16[2,128,512], index: 0, kind: input, shape index: {}]   ;;  %s1895_s1 = inlined_call_operand.hbm [shape: bf16[16,128], index: 1, kind: input, shape index: {}]   ;;  %s1896_s2 = inlined_call_operand.hbm [shape: f32[16,1], index: 2, kind: input, shape index: {}]   ;;  %s1897_s3 = inlined_call_operand.hbm [shape: f32[8,1], index: 3, kind: input, shape index: {}]   ;;  %s1898_s4 = inlined_call_operand.hbm [shape: f32[8,1], index: 4, kind: input, shape index: {}]   ;;  %s1899_s5 = inlined_call_operand.hbm [shape: f32[2,16,512], index: 5, kind: output, shape index: {0}]   ;;  %s1900_s6 = inlined_call_operand.hbm [shape: f32[8,1], index: 6, kind: output, shape index: {1}]   ;;  %s1901_s7 = inlined_call_operand.hbm [shape: f32[8,1], index: 7, kind: output, shape index: {2}]  }
   0x1   :  { %1911 = sst [smem:[#allocation24_spill]] %s1899_s5 }
   0x2   :  { %1912 = sst [smem:[#allocation25_spill]] %s1901_s7 }
   0x3   :  { %13 = vsyncpa [#allocation5], 0 }
   0x4   :  { %15 = vsyncpa [#allocation5 + $0x1], 0 }
   0x5   :  { %16 = vsyncpa [#allocation8], 0 }
   0x6   :  { %17 = vsyncpa [#allocation11], 0 }
   0x7   :  { %18 = vsyncpa [#allocation6], 0 }
   0x8   :  { %20 = vsyncpa [#allocation6 + $0x1], 0 }
   0x9   :  { %21 = vsyncpa [#allocation15], 0  ;;  %s1502_s24 = smov 0   ;;  %s1504_s25 = smov 0  }
   0xa   :  { %s1506_s26 = smov 0   ;;  %s1508_s27 = smov 0  }
   0xb   :  { %s1510_s28 = smov 0   ;;  %s1512_s29 = smov 0  }
   0xc LB: > { %1913 = sst [smem:[#allocation22_spill]] %s1422_s24  ;;  %s908_s30 = sadd.s32 4294967295, %s1442_s29   ;;  %s1442_s29 = sphi %s1512_s29, %s27_s29   ;;  %s1438_s28 = sphi %s1510_s28, %s1939_s28   ;;  %s1434_s27 = sphi %s1508_s27, %s1938_s27   ;;  %s1430_s26 = sphi %s1506_s26, %s1937_s26   ;;  %s1426_s25 = sphi %s1504_s25, %s1936_s25   ;;  %s1422_s24 = sphi %s1502_s24, %s1935_s24  }
   0xd   : > { %s909_s8 = sadd.s32 4294967294, %s1442_s29   ;;  %p61_p0 = scmp.ne.s32.totalorder %s1426_s25, %s1422_s24 }
   0xe   : > { %p1536_p1 = scmp.eq.s32.totalorder %s908_s30, 0  ;;  %p1540_p2 = scmp.eq.s32.totalorder %s908_s30, 1 }
   0xf   : > { %p177_p3 = scmp.eq.s32.totalorder %s909_s8, 1  ;;  %p910_p5 = scmp.ge.s32.totalorder %s1442_s29, 1 }
  0x10   : > { %s1914_s9 = scalar_select %p1536_p1, 1, 0 }
  0x11   : > { %s1915_s10 = scalar_select %p1540_p2, 1, 0 }
  0x12   : > { %p1546_p4 = por %p1536_p1, %p61_p0  ;;  %p1551_p6 = por %p177_p3, %p61_p0 }
  0x13   : > { %p226_p7 = scmp.lt.s32.totalorder %s1442_s29, 3  ;;  %s1444_s14 = smov [#allocation7]  }
  0x14   : > { %s1916_s11 = scalar_select %p1546_p4, 1, 0 }
  0x15   : > { %s1917_s12 = scalar_select %p1551_p6, 1, 0 }
  0x16   : > { %p1556_p8 = pnand %p910_p5, %p226_p7  ;;  %s238_s15 = sshll.u32 %s1444_s14, 4  ;;  %s1560_s15 = int_to_ptr.vmem [resolvable:$true] %s238_s15 }
  0x17   : > { %1918 = sst [smem:[#allocation23_spill]] %s1917_s12  ;;  %s1445_s17 = smov [#allocation10]  }
  0x18   : > { %s1919_s13 = scalar_select %p1556_p8, 1, 0 }
  0x19   : > { %p1002_p9 = pneg %p1556_p8  ;;  %s265_s18 = sshll.u32 %s1445_s17, 4  ;;  %s1571_s18 = int_to_ptr.vmem [resolvable:$true] %s265_s18 }
  0x1a   : > { %s1446_s19 = smov [#allocation9]   ;;  %s1154_s23 = scalar_lea.hbm %s1895_s1, 128 }
  0x1b   : > { %p1567_p11 = pnand %p1002_p9, %p1536_p1  ;;  %s1573_s20 = sshll.u32 %s1446_s19, 4  ;;  %s252_s20 = int_to_ptr.vmem [resolvable:$true] %s1573_s20 }
  0x1c   : > { %p1155_p12 = scmp.ne.s32.totalorder %s1895_s1, %s1154_s23  ;;  %p1161_p5 = scmp.lt.u32.totalorder %s1154_s23, %s1895_s1 }
  0x1d   : > { %p1583_p13 = pneg %p1567_p11 }
  0x1f   : > { %p1157_p0 = pnand %p1583_p13, %p1155_p12 }
  0x21   : > { %p1158_p3 = pneg %p1157_p0 }
  0x23   : > { %p1163_p7 = pnand %p1161_p5, %p1158_p3 }
  0x25   : > { %1166 = shalt.err (!%p1163_p7)
}
  0x26   : > { %s1167_s21 = scalar_lea.vmem %s1560_s15, 128  ;;  %p1175_p1 = scmp.lt.s32.totalorder %s1560_s15, %s1560_s15 }
  0x27   : > { %p1168_p9 = scmp.ne.s32.totalorder %s1560_s15, %s1167_s21  ;;  %p1176_p4 = scmp.lt.s32.totalorder %s1167_s21, %s1167_s21 }
  0x29   : > { %p1170_p10 = pnand %p1168_p9, %p1583_p13  ;;  %p1177_p12 = por %p1176_p4, %p1175_p1 }
  0x2b   : > { %p1171_p6 = pneg %p1170_p10 }
  0x2d   : > { %p1178_p0 = pnand %p1177_p12, %p1171_p6 }
  0x2f   : > { %1181 = shalt.err (!%p1178_p0)
}
  0x30   : > { %s1447_s22 = smov 64   ;;  %s1448_s23 = smov 4  }
  0x31   : > { %1005 = dma.hbm_to_vmem [thread:$0]  (!%p1567_p11), %s1895_s1, 128, %s1560_s15, [#allocation8], %s1447_s22, %s1447_s22, %s1448_s23  }
  0x32   : > { %s1182_s12 = scalar_lea.hbm %s1897_s3, 128 }
  0x33   : > { %p1183_p1 = scmp.ne.s32.totalorder %s1897_s3, %s1182_s12  ;;  %p1189_p10 = scmp.lt.u32.totalorder %s1182_s12, %s1897_s3 }
  0x35   : > { %p1185_p4 = pnand %p1183_p1, %p1583_p13 }
  0x37   : > { %p1186_p6 = pneg %p1185_p4 }
  0x39   : > { %p1191_p3 = pnand %p1189_p10, %p1186_p6 }
  0x3b   : > { %1194 = shalt.err (!%p1191_p3)
}
  0x3c   : > { %s1195_s15 = scalar_lea.vmem %s1571_s18, 128  ;;  %p1203_p12 = scmp.lt.s32.totalorder %s1571_s18, %s1571_s18 }
  0x3d   : > { %p1196_p5 = scmp.ne.s32.totalorder %s1571_s18, %s1195_s15  ;;  %p1204_p0 = scmp.lt.s32.totalorder %s1195_s15, %s1195_s15 }
  0x3f   : > { %p1198_p7 = pnand %p1196_p5, %p1583_p13  ;;  %p1205_p1 = por %p1204_p0, %p1203_p12 }
  0x41   : > { %p1199_p9 = pneg %p1198_p7 }
  0x43   : > { %p1206_p4 = pnand %p1205_p1, %p1199_p9 }
  0x45   : > { %1209 = shalt.err (!%p1206_p4)
}
  0x46   : > { %1011 = dma.hbm_to_vmem [thread:$0]  (!%p1567_p11), %s1897_s3, 128, %s1571_s18, [#allocation11]  }
  0x47   : > { %s1210_s22 = scalar_lea.hbm %s1896_s2, 256 }
  0x48   : > { %p1211_p6 = scmp.ne.s32.totalorder %s1896_s2, %s1210_s22  ;;  %p1217_p5 = scmp.lt.u32.totalorder %s1210_s22, %s1896_s2 }
  0x4a   : > { %p1213_p10 = pnand %p1211_p6, %p1583_p13 }
  0x4c   : > { %p1214_p3 = pneg %p1213_p10 }
  0x4e   : > { %p1219_p7 = pnand %p1217_p5, %p1214_p3 }
  0x50   : > { %1222 = shalt.err (!%p1219_p7)
}
  0x51   : > { %s1223_s19 = scalar_lea.vmem %s252_s20, 256  ;;  %p1231_p1 = scmp.lt.s32.totalorder %s252_s20, %s252_s20 }
  0x52   : > { %p1224_p9 = scmp.ne.s32.totalorder %s252_s20, %s1223_s19  ;;  %p1232_p4 = scmp.lt.s32.totalorder %s1223_s19, %s1223_s19 }
  0x54   : > { %p1226_p12 = pnand %p1224_p9, %p1583_p13  ;;  %p1233_p8 = por %p1232_p4, %p1231_p1 }
  0x56   : > { %p1227_p0 = pneg %p1226_p12 }
  0x58   : > { %p1234_p2 = pnand %p1233_p8, %p1227_p0 }
  0x5a   : > { %1237 = shalt.err (!%p1234_p2)
}
  0x5b   : > { %s1449_s18 = smov 128   ;;  %s1450_s21 = smov 8  }
  0x5c   : > { %1008 = dma.hbm_to_vmem [thread:$0]  (!%p1567_p11), %s1896_s2, 256, %s252_s20, [#allocation8], %s1449_s18, %s1449_s18, %s1450_s21  }
  0x5d   : > { %s1451_s7 = smov [#allocation12]   ;;  %s1238_s23 = scalar_lea.hbm %s1898_s4, 128 }
  0x5e   : > { %s276_s24 = sshll.u32 %s1451_s7, 4  ;;  %p1239_p2 = scmp.ne.s32.totalorder %s1898_s4, %s1238_s23  ;;  %s277_s24 = int_to_ptr.vmem [resolvable:$true] %s276_s24 }
  0x5f   : > { %p1245_p10 = scmp.lt.u32.totalorder %s1238_s23, %s1898_s4 }
  0x60   : > { %p1241_p8 = pnand %p1239_p2, %p1583_p13 }
  0x62   : > { %p1242_p6 = pneg %p1241_p8 }
  0x64   : > { %p1247_p3 = pnand %p1245_p10, %p1242_p6 }
  0x66   : > { %1250 = shalt.err (!%p1247_p3)
}
  0x67   : > { %s1251_s20 = scalar_lea.vmem %s277_s24, 128  ;;  %p1259_p12 = scmp.lt.s32.totalorder %s277_s24, %s277_s24 }
  0x68   : > { %p1252_p5 = scmp.ne.s32.totalorder %s277_s24, %s1251_s20  ;;  %p1260_p0 = scmp.lt.s32.totalorder %s1251_s20, %s1251_s20 }
  0x6a   : > { %p1254_p7 = pnand %p1252_p5, %p1583_p13  ;;  %p1261_p1 = por %p1260_p0, %p1259_p12 }
  0x6c   : > { %p1255_p9 = pneg %p1254_p7 }
  0x6e   : > { %p1262_p4 = pnand %p1261_p1, %p1255_p9 }
  0x70   : > { %1265 = shalt.err (!%p1262_p4)
}
  0x71   : > { %1014 = dma.hbm_to_vmem [thread:$0]  (!%p1567_p11), %s1898_s4, 128, %s277_s24, [#allocation11]  }
  0x72   : > { %s39_s14 = sadd.s32 1, %s1438_s28  ;;  %s48_s15 = sadd.s32 1, %s1430_s26 }
  0x73   : > { %p41_p13 = scmp.ge.s32.totalorder %s39_s14, 2  ;;  %p55_p2 = scmp.ne.s32.totalorder %s1430_s26, %s1426_s25 }
  0x74   : > { %p56_p8 = scmp.eq.s32.totalorder %s1442_s29, 0  ;;  %p1027_p6 = scmp.lt.s32.totalorder %s1442_s29, 2 }
  0x75   : > { %s1941_s14 = smov (%p41_p13, %s39_s14), 0  ;;  %p1922_p3 = scmp.ne.s32.totalorder %s1915_s10, 0 }
  0x76   : > { %p57_p10 = por %p56_p8, %p55_p2  ;;  %s43_s5 = ssub.s32 %s1438_s28, %s1941_s14 }
  0x77   : > { %p1674_p5 = por %p1922_p3, %p55_p2  ;;  %s287_s7 = sand.u32 1, %s1430_s26  }
  0x78   : > { %p46_p7 = scmp.eq.s32.totalorder %s43_s5, 0  ;;  %s916_s24 = sshll.u32 %s287_s7, 8 }
  0x79   : > { %s970_s12 = sshll.u32 %s1438_s28, 12  ;;  %s291_s17 = scalar_lea.vmem [#allocation4], %s916_s24 }
  0x7a   : > { %s1683_s22 = scalar_select %p46_p7, %s1430_s26, %s48_s15  }
  0x7b   : > { %s1688_s8 = scalar_lea.hbm %s1894_s0, %s970_s12  ;;  %s300_s19 = sshll.u32 %s291_s17, 4  ;;  %s1696_s19 = int_to_ptr.vmem [resolvable:$true] %s300_s19 }
  0x7c   : > { %p1692_p11 = pnand %p1027_p6, %p57_p10  ;;  %s1698_s18 = scalar_lea.sflag [#allocation5], %s287_s7 }
  0x7d   : > { %s1266_s21 = scalar_lea.hbm %s1688_s8, 4096  ;;  %s1271_s24 = scalar_lea.hbm %s1894_s0, 8192 }
  0x7e   : > { %p1267_p9 = scmp.ne.s32.totalorder %s1688_s8, %s1266_s21  ;;  %p1268_p12 = pneg %p1692_p11 }
  0x7f   : > { %p1272_p4 = scmp.lt.u32.totalorder %s1688_s8, %s1894_s0  ;;  %p1273_p13 = scmp.lt.u32.totalorder %s1271_s24, %s1266_s21 }
  0x80   : > { %p1269_p0 = pnand %p1268_p12, %p1267_p9  ;;  %p1275_p8 = scmp.lt.u32.totalorder %s1266_s21, %s1688_s8 }
  0x81   : > { %p1274_p2 = por %p1273_p13, %p1272_p4 }
  0x82   : > { %p1270_p1 = pneg %p1269_p0 }
  0x83   : > { %p1276_p6 = por %p1275_p8, %p1274_p2 }
  0x85   : > { %p1277_p10 = pnand %p1276_p6, %p1270_p1 }
  0x87   : > { %1280 = shalt.err (!%p1277_p10)
}
  0x88   : > { %s1281_s7 = scalar_lea.vmem %s1696_s19, 4096  ;;  %s1452_s30 = smov [#allocation4]  }
  0x89   : > { %p1282_p3 = scmp.ne.s32.totalorder %s1696_s19, %s1281_s7  ;;  %s1286_s17 = sshll.u32 %s1452_s30, 4  ;;  %s1287_s17 = int_to_ptr.vmem [resolvable:$false] %s1286_s17 }
  0x8a   : > { %s1288_s15 = scalar_lea.vmem %s1287_s17, 8192  ;;  %p1289_p0 = scmp.lt.s32.totalorder %s1696_s19, %s1287_s17 }
  0x8b   : > { %p1284_p7 = pnand %p1282_p3, %p1268_p12  ;;  %p1290_p4 = scmp.lt.s32.totalorder %s1288_s15, %s1281_s7 }
  0x8d   : > { %p1285_p9 = pneg %p1284_p7  ;;  %p1291_p13 = por %p1290_p4, %p1289_p0 }
  0x8f   : > { %p1292_p2 = pnand %p1291_p13, %p1285_p9 }
  0x91   : > { %1295 = shalt.err (!%p1292_p2)
}
  0x92   : > { %s1453_s21 = smov 256   ;;  %s1454_s5 = smov 16  }
  0x93   : > { %1018 = dma.hbm_to_vmem [thread:$0]  (!%p1692_p11), %s1688_s8, 4096, %s1696_s19, %s1698_s18, %s1453_s21, %s1453_s21, %s1454_s5  }
  0x94   : > { %p1925_p12 = scmp.ne.s32.totalorder %s1919_s13, 0 }
  0x95   : > { %s1729_s24 = sand.u32 (!%p1925_p12), 1, %s1426_s25   ;;  %p1926_p1 = scmp.ne.s32.totalorder (!%p1925_p12), %s1916_s11, 0 }
  0x96   : > { %312 = sbr.rel (%p1925_p12) target bundleno = 685 (0x2ad), region = 40  ;;  %s920_s12 = sshll.u32 (!%p1925_p12), %s1729_s24, 8 }
  0x97   : > { %s315_s23 = scalar_lea.sflag (!%p1925_p12), [#allocation5], %s1729_s24  ;;  %s1733_s7 = scalar_lea.vmem (!%p1925_p12), [#allocation4], %s920_s12 }
  0x9d   : > { %1401 = dma.done.wait (%p1926_p1), %s315_s23, 4096  }
  0x9e   : > { %1403 = vsyncadd (%p1926_p1), %s315_s23, 4294963200  ;;  %p1927_p11 = scmp.ne.s32.totalorder %s1914_s9, 0 }
  0xa0   : > { %1405 = dma.done.wait (%p1927_p11), [#allocation8], 384  }
  0xa1   : > { %1407 = vsyncadd (%p1927_p11), [#allocation8], 4294966912 }
  0xa2   : > { %1409 = dma.done.wait (%p1927_p11), [#allocation11], 256  }
  0xa3   : > { %1411 = vsyncadd (%p1927_p11), [#allocation11], 4294967040  ;;  %s925_s13 = sshll.u32 %s1729_s24, 6  ;;  %p368_p8 = scmp.eq.s32.totalorder %s1434_s27, 0 }
  0xa4   : > { %s1749_s8 = scalar_lea.vmem [#allocation13], %s925_s13  ;;  %vm374_vm0 = vcmask (%p368_p8), 7168   ;;  %v1455_v0 = vmov (%p368_p8), 0.0  }
  0xa5   : > { %373 = sbr.rel (!%p368_p8) target bundleno = 172 (0xac), region = 64  ;;  %375 = vst.msk [vmem:[#allocation2] sm:$0xff] (%p368_p8), %vm374_vm0, %v1455_v0  ;;  %376 = vst.msk [vmem:[#allocation3] sm:$0xff] (%p368_p8), %vm374_vm0, %v1455_v0 }
  0xac PF: > { %v1103_v1 = vld [vmem:[%s1733_s7 + $0x4] ss:$16 sps:$4 sm:$0xff]   ;;  %v1105_v2 = vld [vmem:[%s1733_s7 + $0xc] ss:$16 sps:$4 sm:$0xff]   ;;  %v1456_v3 = vmov 0   ;;  %p704_p6 = scmp.eq.s32.totalorder %s1434_s27, 1 }
  0xad   : > { %621 = vmatprep.mubr.bf16.mxu0 %v1456_v3  ;;  %664 = vmatprep.mubr.bf16.mxu1 %v1456_v3  ;;  %v1107_v4 = vld [vmem:[%s1733_s7] ss:$16 sps:$4 sm:$0xff]   ;;  %v1108_v5 = vld [vmem:[%s1733_s7 + $0x8] ss:$16 sps:$4 sm:$0xff]   ;;  %v1109_v6 = vld [vmem:[%s1733_s7 + $0x24] ss:$16 sps:$4 sm:$0xff]  }
  0xae   : > { %589 = vmatprep.subr.bf16.mxu0 %v1103_v1  ;;  %1101 = vset.pattern.permute.xlu0 %v1456_v3  ;;  %v1111_v7 = vld [vmem:[%s1733_s7 + $0x2c] ss:$16 sps:$4 sm:$0xff]   ;;  %v1113_v8 = vld [vmem:[%s1733_s7 + $0x20] ss:$16 sps:$4 sm:$0xff]   ;;  %v1114_v9 = vld [vmem:[%s1733_s7 + $0x28] ss:$16 sps:$4 sm:$0xff]  }
  0xaf   : > { %632 = vmatprep.subr.bf16.mxu1 %v1105_v2  ;;  %1102 = vset.pattern.permute.xlu1 %v1456_v3  ;;  %v1115_v10 = vld [vmem:[%s1733_s7 + $0x44] ss:$16 sps:$4 sm:$0xff]   ;;  %v1117_v11 = vld [vmem:[%s1733_s7 + $0x4c] ss:$16 sps:$4 sm:$0xff]   ;;  %v1119_v12 = vld [vmem:[%s1733_s7 + $0x40] ss:$16 sps:$4 sm:$0xff]  }
  0xb0   : > { %590 = vmatpush1.bf16.msra.mxu0 %v1107_v4  ;;  %633 = vmatpush1.bf16.msra.mxu1 %v1108_v5  ;;  %v1120_v13 = vld [vmem:[%s1733_s7 + $0x48] ss:$16 sps:$4 sm:$0xff]   ;;  %v1121_v14 = vld [vmem:[%s1733_s7 + $0x64] ss:$16 sps:$4 sm:$0xff]   ;;  %v1123_v15 = vld [vmem:[%s1733_s7 + $0x6c] ss:$16 sps:$4 sm:$0xff]  }
  0xb1   : > { %591 = vmatprep.subr.bf16.mxu0 %v1109_v6  ;;  %634 = vmatprep.subr.bf16.mxu1 %v1111_v7  ;;  %v1125_v16 = vld [vmem:[%s1733_s7 + $0x60] ss:$16 sps:$4 sm:$0xff]   ;;  %v1126_v17 = vld [vmem:[%s1733_s7 + $0x68] ss:$16 sps:$4 sm:$0xff]   ;;  %v1127_v18 = vld [vmem:[%s1733_s7 + $0x84] ss:$16 sps:$4 sm:$0xff]  }
  0xb2   : > { %v1129_v19 = vld [vmem:[%s1733_s7 + $0x8c] ss:$16 sps:$4 sm:$0xff]   ;;  %v1131_v20 = vld [vmem:[%s1733_s7 + $0x80] ss:$16 sps:$4 sm:$0xff]   ;;  %v1132_v21 = vld [vmem:[%s1733_s7 + $0x88] ss:$16 sps:$4 sm:$0xff]  }
  0xb3   : > { %v1133_v22 = vld [vmem:[%s1733_s7 + $0xa4] ss:$16 sps:$4 sm:$0xff]   ;;  %v1135_v23 = vld [vmem:[%s1733_s7 + $0xac] ss:$16 sps:$4 sm:$0xff]   ;;  %v1137_v24 = vld [vmem:[%s1733_s7 + $0xa0] ss:$16 sps:$4 sm:$0xff]  }
  0xb4   : > { %592 = vmatpush1.bf16.msra.mxu0 %v1113_v8  ;;  %635 = vmatpush1.bf16.msra.mxu1 %v1114_v9  ;;  %v1138_v25 = vld [vmem:[%s1733_s7 + $0xa8] ss:$16 sps:$4 sm:$0xff]   ;;  %v1139_v26 = vld [vmem:[%s1733_s7 + $0xc4] ss:$16 sps:$4 sm:$0xff]   ;;  %v1141_v27 = vld [vmem:[%s1733_s7 + $0xcc] ss:$16 sps:$4 sm:$0xff]  }
  0xb5   : > { %593 = vmatprep.subr.bf16.mxu0 %v1115_v10  ;;  %636 = vmatprep.subr.bf16.mxu1 %v1117_v11  ;;  %v411_v28 = vld [vmem:[#allocation9] sm:$0xff]  ;;  %v1143_v29 = vld [vmem:[%s1733_s7 + $0xc0] ss:$16 sps:$4 sm:$0xff]   ;;  %v1145_v31 = vld [vmem:[%s1733_s7 + $0xe4] ss:$16 sps:$4 sm:$0xff]   ;;  %vm690_vm1 = vcmask 7168  }
  0xb6   : > { %415 = vperm.xlu0 %1101, %v411_v28   ;;  %v1144_v30 = vld [vmem:[%s1733_s7 + $0xc8] ss:$16 sps:$4 sm:$0xff]   ;;  %v1147_v32 = vld [vmem:[%s1733_s7 + $0xec] ss:$16 sps:$4 sm:$0xff]   ;;  %v1149_v33 = vld [vmem:[%s1733_s7 + $0xe0] ss:$16 sps:$4 sm:$0xff]  }
  0xb7   : > { %v1150_v34 = vld [vmem:[%s1733_s7 + $0xe8] ss:$16 sps:$4 sm:$0xff]   ;;  %v1151_v35 = vld [vmem:[#allocation7] sm:$0xff]   ;;  %v412_v59 = vld [vmem:[#allocation9 + $0x8] sm:$0xff] }
  0xb8   : > { %594 = vmatpush1.bf16.msra.mxu0 %v1119_v12  ;;  %637 = vmatpush1.bf16.msra.mxu1 %v1120_v13  ;;  %v683_v60 = vld [vmem:[#allocation2] sm:$0xff]  ;;  %v692_v62 = vld [vmem:[#allocation3] sm:$0xff] }
  0xb9   : > { %595 = vmatprep.subr.bf16.mxu0 %v1121_v14  ;;  %638 = vmatprep.subr.bf16.mxu1 %v1123_v15  ;;  %v715_v14 = vld [vmem:[#allocation10] sm:$0xff] (%p704_p6) }
  0xbc   : > { %596 = vmatpush1.bf16.msra.mxu0 %v1125_v16  ;;  %639 = vmatpush1.bf16.msra.mxu1 %v1126_v17  ;;  %v720_v17 = vld [vmem:[#allocation12] sm:$0xff] (%p704_p6) }
  0xbd   : > { %597 = vmatprep.subr.bf16.mxu0 %v1127_v18  ;;  %640 = vmatprep.subr.bf16.mxu1 %v1129_v19 }
  0xc0   : > { %598 = vmatpush1.bf16.msra.mxu0 %v1131_v20  ;;  %641 = vmatpush1.bf16.msra.mxu1 %v1132_v21 }
  0xc1   : > { %599 = vmatprep.subr.bf16.mxu0 %v1133_v22  ;;  %642 = vmatprep.subr.bf16.mxu1 %v1135_v23 }
  0xc4   : > { %600 = vmatpush1.bf16.msra.mxu0 %v1137_v24  ;;  %643 = vmatpush1.bf16.msra.mxu1 %v1138_v25 }
  0xc5   : > { %601 = vmatprep.subr.bf16.mxu0 %v1139_v26  ;;  %644 = vmatprep.subr.bf16.mxu1 %v1141_v27 }
  0xc8   : > { %602 = vmatpush1.bf16.msra.mxu0 %v1143_v29  ;;  %645 = vmatpush1.bf16.msra.mxu1 %v1144_v30 }
  0xc9   : > { %603 = vmatprep.subr.bf16.mxu0 %v1145_v31  ;;  %646 = vmatprep.subr.bf16.mxu1 %v1147_v32 }
  0xcc   : > { %604 = vmatpush1.bf16.msra.mxu0 %v1149_v33  ;;  %647 = vmatpush1.bf16.msra.mxu1 %v1150_v34 }
  0xcf   : > { %622 = vmatmul.mubr.bf16.vlgmr.msra.gmra.mrb[0].mxu0 %v1151_v35  ;;  %665 = vmatmul.mubr.bf16.vlgmr.msra.gmra.mrb[0].mxu1 %v1151_v35 }
 0x135   : > { %v416_v36 = vpop.permute.xlu0 %415 }
 0x1a2   : > { %v623_v37 = vpop.f32.mrb[0].mxu0  ;;  %v666_v38 = vpop.f32.mrb[0].mxu1 }
 0x1a3   : > { %v624_v39 = vadd.f32 %v623_v37, %v416_v36  ;;  %v667_v40 = vadd.f32 %v666_v38, %v416_v36  ;;  %v625_v41 = vpop.f32.mrb[1].mxu0  ;;  %v668_v42 = vpop.f32.mrb[1].mxu1 }
 0x1a4   : > { %v626_v43 = vadd.f32 %v625_v41, %v416_v36  ;;  %v669_v44 = vadd.f32 %v668_v42, %v416_v36  ;;  %v627_v45 = vpop.f32.mrb[2].mxu0  ;;  %v670_v46 = vpop.f32.mrb[2].mxu1 }
 0x1a5   : > { %675 = vst [vmem:[%s1749_s8] sm:$0xff] %v624_v39  ;;  %v693_v47 = vmul.f32 %v624_v39, %v624_v39  ;;  %677 = vst [vmem:[%s1749_s8 + $0x10] sm:$0xff] %v667_v40  ;;  %v629_v48 = vpop.f32.mrb[3].mxu0  ;;  %v672_v49 = vpop.f32.mrb[3].mxu1  ;;  %v695_v53 = vmul.f32 %v667_v40, %v667_v40 }
 0x1a6   : > { %676 = vst [vmem:[%s1749_s8 + $0x8] sm:$0xff] %v626_v43  ;;  %v684_v50 = vadd.f32 %v626_v43, %v624_v39  ;;  %v694_v51 = vmul.f32 %v626_v43, %v626_v43  ;;  %678 = vst [vmem:[%s1749_s8 + $0x18] sm:$0xff] %v669_v44  ;;  %v696_v56 = vmul.f32 %v669_v44, %v669_v44 }
 0x1a8   : > { %v685_v52 = vadd.f32 %v684_v50, %v667_v40  ;;  %v697_v54 = vadd.f32 %v694_v51, %v693_v47 }
 0x1aa   : > { %v686_v55 = vadd.f32 %v685_v52, %v669_v44  ;;  %v698_v57 = vadd.f32 %v697_v54, %v695_v53 }
 0x1ac   : > { %687 = vadd.xlane.f32.xlu0 %v686_v55  ;;  %v699_v58 = vadd.f32 %v698_v57, %v696_v56 }
 0x1ae   : > { %700 = vadd.xlane.f32.xlu1 %v699_v58 }
 0x1bf   : > { %420 = vperm.xlu1 %1102, %v412_v59  }
 0x239   : > { %v688_v61 = vpop.xlane.xlu0 %687 }
 0x23a   : > { %v689_v63 = vadd.f32 %v688_v61, %v683_v60 }
 0x23b   : > { %v701_v0 = vpop.xlane.xlu1 %700 }
 0x23c   : > { %691 = vst.msk [vmem:[#allocation2] sm:$0xff] %vm690_vm1, %v689_v63  ;;  %v702_v1 = vadd.f32 %v701_v0, %v692_v62 }
 0x23d   : > { %708 = sbr.rel (!%p704_p6) target bundleno = 606 (0x25e), region = 68 }
 0x23e   : > { %703 = vst.msk [vmem:[#allocation3] sm:$0xff] %vm690_vm1, %v702_v1 }
 0x23f   : > { %v421_v2 = vpop.permute.xlu1 %420 }
 0x240   : > { %v628_v3 = vadd.f32 %v627_v45, %v421_v2  ;;  %v630_v4 = vadd.f32 %v629_v48, %v421_v2  ;;  %v671_v5 = vadd.f32 %v670_v46, %v421_v2  ;;  %v673_v6 = vadd.f32 %v672_v49, %v421_v2 }
 0x242   : > { %679 = vst [vmem:[%s1749_s8 + $0x20] sm:$0xff] %v628_v3  ;;  %680 = vst [vmem:[%s1749_s8 + $0x28] sm:$0xff] %v630_v4 }
 0x243   : > { %681 = vst [vmem:[%s1749_s8 + $0x30] sm:$0xff] %v671_v5  ;;  %682 = vst [vmem:[%s1749_s8 + $0x38] sm:$0xff] %v673_v6  ;;  %v709_v7 = vld [vmem:[#allocation2] sm:$0xff] (%p704_p6) }
 0x244   : > { %v710_v9 = vmul.f32 0.0009765625, %v709_v7 }
 0x245   : > { %v711_v8 = vld [vmem:[#allocation3] sm:$0xff] }
 0x246   : > { %v712_v10 = vmul.f32 0.0009765625, %v711_v8  ;;  %v713_v11 = vmul.f32 %v710_v9, %v710_v9 }
 0x248   : > { %v714_v12 = vsub.f32 %v712_v10, %v713_v11 }
 0x24a   : > { %v716_v13 = vadd.f32 1e-05, %v714_v12 }
 0x24c   : > { %1152 = vrsqrt.f32 %v716_v13 }
 0x256   : > { %v1153_v15 = vpop.eup %1152 }
 0x257   : > { %v718_v16 = vmul.f32 %v1153_v15, %v715_v14 }
 0x259   : > { %719 = vst.msk [vmem:[#allocation14] sm:$0xff] %vm690_vm1, %v718_v16  ;;  %v721_v18 = vmul.f32 %v718_v16, %v710_v9 }
 0x25b   : > { %v722_v19 = vsub.f32 %v720_v17, %v721_v18 }
 0x25d   : > { %723 = vst.msk [vmem:[#allocation16] sm:$0xff] %vm690_vm1, %v722_v19 }
 0x25e PF: > { %s1457_s9 = smov [#allocation14]   ;;  %s973_s19 = sshll.u32 %s1434_s27, 10 }
 0x25f   : > { %s754_s11 = sshll.u32 %s1457_s9, 4  ;;  %p1928_p3 = scmp.ne.s32.totalorder %s1915_s10, 0  ;;  %s755_s11 = int_to_ptr.vmem [resolvable:$true] %s754_s11 }
 0x260   : > { %s1296_s20 = scalar_lea.vmem %s755_s11, 128  ;;  %p1303_p0 = scmp.lt.s32.totalorder %s755_s11, %s755_s11 }
 0x261   : > { %p1297_p10 = scmp.ne.s32.totalorder %s755_s11, %s1296_s20  ;;  %p1304_p4 = scmp.lt.s32.totalorder %s1296_s20, %s1296_s20 }
 0x263   : > { %p1298_p7 = pnand %p1297_p10, %p1928_p3  ;;  %p1305_p13 = por %p1304_p4, %p1303_p0 }
 0x265   : > { %p1299_p9 = pneg %p1298_p7 }
 0x267   : > { %p1306_p2 = pnand %p1305_p13, %p1299_p9 }
 0x269   : > { %1309 = shalt.err (!%p1306_p2)
}
 0x26a   : > { %s1310_s17 = scalar_lea.hbm %s1900_s6, 128 }
 0x26b   : > { %p1311_p12 = scmp.ne.s32.totalorder %s1900_s6, %s1310_s17  ;;  %p1316_p8 = scmp.lt.u32.totalorder %s1310_s17, %s1900_s6 }
 0x26d   : > { %p1312_p1 = pnand %p1311_p12, %p1928_p3 }
 0x26f   : > { %p1313_p11 = pneg %p1312_p1 }
 0x271   : > { %p1318_p6 = pnand %p1316_p8, %p1313_p11 }
 0x273   : > { %1321 = shalt.err (!%p1318_p6)
}
 0x274   : > { %994 = dma.vmem_to_hbm [thread:$0]  (%p1928_p3), %s755_s11, 128, %s1900_s6, [#allocation15]  }
 0x275   : > { %s1929_s9 = sld [smem:[#allocation24_spill]]  ;;  %s740_s18 = sshll.u32 %s1749_s8, 4  ;;  %s1823_s18 = int_to_ptr.vmem [resolvable:$true] %s740_s18 }
 0x276   : > { %s725_s30 = scalar_lea.sflag [#allocation6], %s1729_s24  ;;  %s1322_s17 = scalar_lea.vmem %s1823_s18, 1024 }
 0x277   : > { %p1323_p10 = scmp.ne.s32.totalorder %s1823_s18, %s1322_s17  ;;  %s1458_s15 = smov [#allocation13]  }
 0x278   : > { %s1326_s21 = sshll.u32 %s1458_s15, 4  ;;  %s1327_s21 = int_to_ptr.vmem [resolvable:$false] %s1326_s21 }
 0x279   : > { %p1324_p7 = pnand %p1323_p10, %p1674_p5  ;;  %s1328_s11 = scalar_lea.vmem %s1327_s21, 2048 }
 0x27a   : > { %p1329_p0 = scmp.lt.s32.totalorder %s1823_s18, %s1327_s21  ;;  %p1330_p4 = scmp.lt.s32.totalorder %s1328_s11, %s1322_s17 }
 0x27b   : > { %s1820_s20 = scalar_lea.hbm %s1929_s9, %s973_s19  ;;  %p1325_p9 = pneg %p1324_p7 }
 0x27c   : > { %p1331_p13 = por %p1330_p4, %p1329_p0 }
 0x27e   : > { %p1332_p2 = pnand %p1331_p13, %p1325_p9 }
 0x280   : > { %1335 = shalt.err (!%p1332_p2)
}
 0x281   : > { %s1336_s8 = scalar_lea.hbm %s1820_s20, 1024  ;;  %s1340_s5 = scalar_lea.hbm %s1929_s9, 2048 }
 0x282   : > { %p1337_p12 = scmp.ne.s32.totalorder %s1820_s20, %s1336_s8  ;;  %p1341_p8 = scmp.lt.u32.totalorder %s1820_s20, %s1929_s9 }
 0x283   : > { %p1342_p6 = scmp.lt.u32.totalorder %s1340_s5, %s1336_s8  ;;  %p1344_p7 = scmp.lt.u32.totalorder %s1336_s8, %s1820_s20 }
 0x284   : > { %p1338_p1 = pnand %p1337_p12, %p1674_p5 }
 0x285   : > { %p1343_p10 = por %p1342_p6, %p1341_p8 }
 0x286   : > { %p1339_p11 = pneg %p1338_p1 }
 0x287   : > { %p1345_p9 = por %p1344_p7, %p1343_p10 }
 0x289   : > { %p1346_p0 = pnand %p1345_p9, %p1339_p11 }
 0x28b   : > { %1349 = shalt.err (!%p1346_p0)
}
 0x28c   : > { %s1459_s7 = smov 512   ;;  %s1460_s13 = smov 32  }
 0x28d   : > { %992 = dma.vmem_to_hbm [thread:$0]  (%p1674_p5), %s1823_s18, 1024, %s1820_s20, %s725_s30, %s1459_s7, %s1459_s7, %s1460_s13  }
 0x28e   : > { %s1461_s17 = smov [#allocation16]  }
 0x28f   : > { %s765_s15 = sshll.u32 %s1461_s17, 4  ;;  %s766_s15 = int_to_ptr.vmem [resolvable:$true] %s765_s15 }
 0x290   : > { %s1350_s21 = scalar_lea.vmem %s766_s15, 128  ;;  %p1357_p12 = scmp.lt.s32.totalorder %s766_s15, %s766_s15 }
 0x291   : > { %p1351_p4 = scmp.ne.s32.totalorder %s766_s15, %s1350_s21  ;;  %p1358_p1 = scmp.lt.s32.totalorder %s1350_s21, %s1350_s21 }
 0x293   : > { %p1352_p13 = pnand %p1351_p4, %p1928_p3  ;;  %p1359_p11 = por %p1358_p1, %p1357_p12 }
 0x295   : > { %p1353_p2 = pneg %p1352_p13 }
 0x297   : > { %p1360_p8 = pnand %p1359_p11, %p1353_p2 }
 0x299   : > { %1363 = shalt.err (!%p1360_p8)
}
 0x29a   : > { %s1930_s19 = sld [smem:[#allocation25_spill]] }
 0x2a0   : > { %s1364_s16 = scalar_lea.hbm %s1930_s19, 128 }
 0x2a1   : > { %p1365_p5 = scmp.ne.s32.totalorder %s1930_s19, %s1364_s16  ;;  %p1370_p7 = scmp.lt.u32.totalorder %s1364_s16, %s1930_s19 }
 0x2a3   : > { %p1366_p6 = pnand %p1365_p5, %p1928_p3 }
 0x2a5   : > { %p1367_p10 = pneg %p1366_p6 }
 0x2a7   : > { %p1372_p9 = pnand %p1370_p7, %p1367_p10 }
 0x2a9   : > { %1375 = shalt.err (!%p1372_p9)
}
 0x2aa   : > { %996 = dma.vmem_to_hbm [thread:$0]  (%p1928_p3), %s766_s15, 128, %s1930_s19, [#allocation15]  }
 0x2ab   : > { %1413 = dma.done.wait (%p1928_p3), [#allocation15], 256  }
 0x2ac   : > { %1415 = vsyncadd (%p1928_p3), [#allocation15], 4294967040 }
 0x2ad PF: > { %s1931_s12 = sld [smem:[#allocation22_spill]]  ;;  %s1932_s23 = sld [smem:[#allocation23_spill]] }
 0x2ae   : > { %p1934_p4 = scmp.ge.s32.totalorder %s1442_s29, 2 }
 0x2b3   : > { %s785_s7 = sand.u32 1, %s1931_s12   ;;  %p1933_p0 = scmp.ne.s32.totalorder %s1932_s23, 0 }
 0x2b4   : > { %s786_s13 = scalar_lea.sflag [#allocation6], %s785_s7 }
 0x2b5   : > { %p1020_p13 = pnand %p1934_p4, %p1933_p0 }
 0x2b7   : > { %1417 = dma.done.wait (!%p1020_p13), %s786_s13, 1024  }
 0x2b8   : > { %1419 = vsyncadd (!%p1020_p13), %s786_s13, 4294966272  ;;  %s27_s29 = sadd.s32 1, %s1442_s29   ;;  %s1935_s24 = smov %s1426_s25 }
 0x2b9   : > { %p24_p2 = scmp.ge.s32.totalorder %s27_s29, 4   ;;  %s1936_s25 = smov %s1430_s26 }
 0x2ba   : > { %s1937_s26 = smov %s1683_s22  ;;  %s1938_s27 = smov %s1438_s28 }
 0x2bb   : > { %s1939_s28 = smov %s1941_s14  ;;  %26 = sbr.rel (!%p24_p2) target bundleno = 12 (0xc), region = 125 }
 0x2c2   :  { %791 = vsyncpa [#allocation5], 1 }
 0x2c3   :  { %793 = vsyncpa [#allocation5 + $0x1], 1 }
 0x2c4   :  { %794 = vsyncpa [#allocation8], 1 }
 0x2c5   :  { %795 = vsyncpa [#allocation11], 1 }
 0x2c6   :  { %796 = vsyncpa [#allocation6], 1 }
 0x2c7   :  { %798 = vsyncpa [#allocation6 + $0x1], 1 }
 0x2c8   :  { %799 = vsyncpa [#allocation15], 1 }

</bundles_post_ra>
